<compile_context>
chip_gen: v7x
topology: tpu7x:2x2x1
jax: 0.10.0
libtpu: 0.0.40
codegen_flags: <defaults>
</compile_context>

<pallas_src>
import functools

import jax
import jax.numpy as jnp
from jax.experimental import pallas as pl
from jax.experimental.pallas import tpu as pltpu

# ----------------------------- config ---------------------------------------
# Original script: unlabeled_batchsize = 80.  Scaled down for a small test,
# but sized so the grid has 2 blocks and exercises the multi-block path.
UNLABELED_BATCHSIZE = 12
LABELED_BATCHSIZE = 4
BATCH = UNLABELED_BATCHSIZE + LABELED_BATCHSIZE   # img batch
# The original module's (sgld_logsumexp - logsumexp) elementwise subtraction
# requires the SGLD batch to equal the image batch.
SGLD_BATCH = BATCH
C_IN = 4
H = W = 16
HW = H * W
C_HID = 8
NUM_CLASSES = 10
KSIZE = 3
KKC = KSIZE * KSIZE * C_IN

TILE_IMG = 16                   # images per grid step (multiple of 16 for bf16)
MXU_DTYPE = jnp.bfloat16        # conv-matmul operand dtype (f32 accumulation).
                                # Set to jnp.float32 for bit-exact f32 runs.
# TODO(synk): on v7x an fp8 cast of the image operand would halve bytes again,
# but it is not numerically drop-in; left as bf16 on all generations.


# ----------------------------- fused Pallas kernel ---------------------------
def fused_block_kernel(x_ref, wband_ref, bconv_ref, wfold_ref, bfc_ref,
                       oh_ref, wts_ref, out_ref, *, tile_img, h, w):
    """conv(+bias,ReLU) -> global avg pool -> linear -> per-block loss partials.

    x_ref    : (h+2, tile_img, (w+2)*C_IN)  padded image, (y_pad, img, x_pad*ci)
    wband_ref: (KSIZE, (w+2)*C_IN, w*C_HID) banded conv weight (one band per dy)
    bconv_ref: (1, w*C_HID)   conv bias tiled over x (lane = x*C_HID + co)
    wfold_ref: (w*C_HID, NUM_CLASSES)  classifier weight with x-pool & 1/HW folded in
    bfc_ref  : (1, NUM_CLASSES)
    oh_ref   : (tile_img, NUM_CLASSES)  one-hot targets (zeros for unlabeled/sgld)
    wts_ref  : (tile_img, 2)  col0 = CE weight, col1 = JEM (+/- 1/B) weight
    out_ref  : (1, 8, 128)    lanes 0/1 of row 0 hold the two loss partial sums
    """
    x = x_ref[...]                                   # (h+2, tile, (w+2)*C_IN)
    rows = h * tile_img
    wcin = x.shape[-1]

    # 1) conv as 3 banded MXU matmuls (one per kernel row dy).  The dy shift is
    #    a static slice of the leading axis -> no sublane shuffles needed.
    acc = jnp.zeros((rows, w * C_HID), jnp.float32)
    for dy in range(KSIZE):
        xs = x[dy:dy + h].reshape(rows, wcin)        # rows ordered (y, img)
        acc += jnp.dot(xs, wband_ref[dy], preferred_element_type=jnp.float32)

    feat = jnp.maximum(acc + bconv_ref[...], 0.0)    # (rows, w*C_HID) f32

    # 2) global average pool: y-pool is a free-view reshape + leading-axis sum;
    #    the x-pool and the 1/HW scale are folded into wfold_ref (wrapper-side).
    ysum = jnp.sum(feat.reshape(h, tile_img, w * C_HID), axis=0)   # (tile, w*C_HID)

    # 3) classifier head.
    logits = (jnp.dot(ysum, wfold_ref[...], preferred_element_type=jnp.float32)
              + bfc_ref[...])                        # (tile, NUM_CLASSES)

    # 4) per-row logsumexp + weighted loss partial sums.
    m = jnp.max(logits, axis=1, keepdims=True)
    lse = m + jnp.log(jnp.sum(jnp.exp(logits - m), axis=1, keepdims=True))
    true_logit = jnp.sum(logits * oh_ref[...], axis=1, keepdims=True)

    wts = wts_ref[...]
    l1 = jnp.sum((lse - true_logit) * wts[:, 0:1], axis=0, keepdims=True)  # (1,1)
    l2 = jnp.sum(lse * wts[:, 1:2], axis=0, keepdims=True)                 # (1,1)

    # pack both partials into one small lane-indexed store
    col = jax.lax.broadcasted_iota(jnp.int32, (8, 128), 1)
    packed = jnp.where(col == 0, l1, jnp.where(col == 1, l2, 0.0))
    out_ref[...] = packed[None]


def fused_forward_pallas(x_pad_t, wband, bias_lane, wfold, b_fc, onehot, wts,
                         *, tile_img):
    hp2, n_img, wcin = x_pad_t.shape
    h = hp2 - 2
    n_blocks = n_img // tile_img

    partial = pl.pallas_call(
        functools.partial(fused_block_kernel, tile_img=tile_img, h=h, w=W),
        out_shape=jax.ShapeDtypeStruct((n_blocks, 8, 128), jnp.float32),
        grid=(n_blocks,),
        in_specs=[
            pl.BlockSpec((hp2, tile_img, wcin), lambda i: (0, i, 0)),
            pl.BlockSpec(wband.shape, lambda i: (0, 0, 0)),
            pl.BlockSpec(bias_lane.shape, lambda i: (0, 0)),
            pl.BlockSpec(wfold.shape, lambda i: (0, 0)),
            pl.BlockSpec(b_fc.shape, lambda i: (0, 0)),
            pl.BlockSpec((tile_img, NUM_CLASSES), lambda i: (i, 0)),
            pl.BlockSpec((tile_img, 2), lambda i: (i, 0)),
        ],
        out_specs=pl.BlockSpec((1, 8, 128), lambda i: (i, 0, 0)),
        compiler_params=pltpu.CompilerParams(
            dimension_semantics=("parallel",)),    # megacore / v7x 2-TC safe
    )(x_pad_t, wband, bias_lane, wfold, b_fc, onehot, wts)

    # tiny final reduction over blocks (kept outside so 'parallel' stays safe)
    loss1 = jnp.sum(partial[:, 0, 0])
    loss2 = jnp.sum(partial[:, 0, 1])
    return loss1, loss2


# ----------------------------- glue (plain JAX) -------------------------------
def build_banded_conv_weight(w_conv):
    """(K*K*C_IN, C_HID) im2col weight -> (K, (W+2)*C_IN, W*C_HID) banded form.

    wband[dy, xx*C_IN + ci, x*C_HID + co] = w[dy, xx-x, ci, co] for xx-x in [0,K),
    so a matmul of padded rows against wband[dy] is the dy-row partial of the conv.
    """
    w4 = w_conv.reshape(KSIZE, KSIZE, C_IN, C_HID)          # (dy, dx, ci, co)
    wband = jnp.zeros((KSIZE, (W + 2) * C_IN, W * C_HID), jnp.float32)
    for dx in range(KSIZE):
        for xo in range(W):
            wband = wband.at[:, (xo + dx) * C_IN:(xo + dx + 1) * C_IN,
                             xo * C_HID:(xo + 1) * C_HID].set(w4[:, dx])
    return wband


def main_model_forward(params, img, label, sgld_img):
    """Pallas equivalent of MainModel.forward(img, label, sgld_img)."""
    # The original torch code's (sgld_lse - lse) elementwise subtraction requires
    # matching batches; make that explicit instead of silently mis-normalizing.
    assert sgld_img.shape[0] == img.shape[0], "sgld batch must equal img batch"

    both = jnp.concatenate([img, sgld_img], axis=0)           # (n_img, C, H, W)
    n_img = both.shape[0]
    assert n_img % TILE_IMG == 0, "image count must be a multiple of TILE_IMG"

    # raw padded NHWC image, transposed so the conv's dy-shift is a leading-axis
    # slice inside the kernel: (H+2, n_img, (W+2)*C_IN)
    x = jnp.transpose(both, (0, 2, 3, 1)).astype(jnp.float32)
    xp = jnp.pad(x, ((0, 0), (1, 1), (1, 1), (0, 0)))
    x_pad_t = jnp.transpose(xp, (1, 0, 2, 3)).reshape(H + 2, n_img, (W + 2) * C_IN)
    x_pad_t = x_pad_t.astype(MXU_DTYPE)

    # weight preprocessing (tiny, once per step): banded conv weight (bf16),
    # conv bias tiled over x, classifier weight with x-pool + 1/HW folded in.
    wband = build_banded_conv_weight(params["w_conv"]).astype(MXU_DTYPE)
    bias_lane = jnp.tile(params["b_conv"].reshape(1, C_HID), (1, W))     # (1, W*C_HID)
    wfold = jnp.tile(params["w_fc"] * (1.0 / HW), (W, 1))                # (W*C_HID, K)
    b_fc = params["b_fc"].reshape(1, NUM_CLASSES)

    # per-image loss weights: col0 CE weight (1/n_lab on labeled img rows),
    # col1 JEM weight (-1/B on img rows, +1/B on sgld rows)
    idx = jnp.arange(n_img)
    is_img = idx < BATCH
    is_lab = (idx >= UNLABELED_BATCHSIZE) & is_img
    wce = jnp.where(is_lab, 1.0 / LABELED_BATCHSIZE, 0.0)
    wjem = jnp.where(is_img, -1.0 / BATCH, 1.0 / SGLD_BATCH)
    wts = jnp.stack([wce, wjem], axis=1).astype(jnp.float32)             # (n_img, 2)

    onehot = jnp.zeros((n_img, NUM_CLASSES), jnp.float32)
    onehot = onehot.at[UNLABELED_BATCHSIZE:BATCH].set(
        jax.nn.one_hot(label, NUM_CLASSES, dtype=jnp.float32))

    return fused_forward_pallas(x_pad_t, wband, bias_lane, wfold, b_fc,
                                onehot, wts, tile_img=TILE_IMG)


# ----------------------------- reference (for sanity) -------------------------
def im2col_nhwc(x_nhwc, k=KSIZE, pad=1):
    b, h, w, c = x_nhwc.shape
    xp = jnp.pad(x_nhwc, ((0, 0), (pad, pad), (pad, pad), (0, 0)))
    cols = [xp[:, dy:dy + h, dx:dx + w, :] for dy in range(k) for dx in range(k)]
    return jnp.concatenate(cols, axis=-1).reshape(b * h * w, k * k * c)


def reference_forward(params, img, label, sgld_img):
    hi = jax.lax.Precision.HIGHEST
    # mirror the kernel's bf16 rounding of the conv MXU operands
    wc = params["w_conv"].astype(MXU_DTYPE).astype(jnp.float32)

    def enc(im):
        x = jnp.transpose(im, (0, 2, 3, 1)).astype(jnp.float32)
        p = im2col_nhwc(x).astype(MXU_DTYPE).astype(jnp.float32)
        f = jnp.maximum(jnp.dot(p, wc, precision=hi) + params["b_conv"], 0.0)
        pooled = jnp.mean(f.reshape(im.shape[0], HW, C_HID), axis=1)
        return jnp.dot(pooled, params["w_fc"], precision=hi) + params["b_fc"]

    pred = enc(img)
    sgld_pred = enc(sgld_img)
    lab = pred[UNLABELED_BATCHSIZE:, :]
    lse_all = jax.scipy.special.logsumexp(pred, axis=1)
    lse_lab = jax.scipy.special.logsumexp(lab, axis=1)
    true_logit = jnp.take_along_axis(lab, label[:, None], axis=1)[:, 0]
    loss1 = jnp.mean(lse_lab - true_logit)
    loss2 = jnp.mean(jax.scipy.special.logsumexp(sgld_pred, axis=1) - lse_all)
    return loss1, loss2


# ----------------------------- main -------------------------------------------
if __name__ == "__main__":
    key = jax.random.PRNGKey(0)
    k_img, k_sgld, k_lbl, k_wc, k_bc, k_wf, k_bf = jax.random.split(key, 7)

    img = jax.random.normal(k_img, (BATCH, C_IN, H, W), dtype=jnp.float32)
    sgld_img = jax.random.normal(k_sgld, (SGLD_BATCH, C_IN, H, W), dtype=jnp.float32)
    label = jax.random.randint(k_lbl, (LABELED_BATCHSIZE,), 0, NUM_CLASSES)

    params = {
        "w_conv": 0.1 * jax.random.normal(k_wc, (KKC, C_HID), dtype=jnp.float32),
        "b_conv": 0.1 * jax.random.normal(k_bc, (1, C_HID), dtype=jnp.float32),
        "w_fc": 0.1 * jax.random.normal(k_wf, (C_HID, NUM_CLASSES),
                                        dtype=jnp.float32),
        "b_fc": 0.1 * jax.random.normal(k_bf, (1, NUM_CLASSES), dtype=jnp.float32),
    }

    loss1, loss2 = jax.jit(main_model_forward)(params, img, label, sgld_img)
    jax.block_until_ready((loss1, loss2))

    ref1, ref2 = reference_forward(params, img, label, sgld_img)
    assert jnp.allclose(loss1, ref1, atol=1e-3, rtol=1e-3), (loss1, ref1)
    assert jnp.allclose(loss2, ref2, atol=1e-3, rtol=1e-3), (loss2, ref2)

    print("KERNEL_OK")
</pallas_src>

<mosaic_0001>
module attributes {stable_mosaic.version = 11 : i64} {
  func.func @fused_block_kernel(%arg0: i32, %arg1: memref<18x16x72xbf16, #tpu.memory_space<vmem>>, %arg2: memref<3x72x128xbf16, #tpu.memory_space<vmem>>, %arg3: memref<1x128xf32, #tpu.memory_space<vmem>>, %arg4: memref<128x10xf32, #tpu.memory_space<vmem>>, %arg5: memref<1x10xf32, #tpu.memory_space<vmem>>, %arg6: memref<16x10xf32, #tpu.memory_space<vmem>>, %arg7: memref<16x2xf32, #tpu.memory_space<vmem>>, %arg8: memref<1x8x128xf32, #tpu.memory_space<vmem>>) attributes {dimension_semantics = [#tpu.dimension_semantics<parallel>], iteration_bounds = array<i64: 2>, scalar_prefetch = 0 : i64, scratch_operands = 0 : i64, tpu.core_type = #tpu.core_type<tc>, window_params = [{transform_indices = @transform_0, window_bounds = array<i64: 18, 16, 72>}, {pipeline_mode = #tpu.pipeline_mode<synchronous>, transform_indices = @transform_1, window_bounds = array<i64: 3, 72, 128>}, {pipeline_mode = #tpu.pipeline_mode<synchronous>, transform_indices = @transform_2, window_bounds = array<i64: 1, 128>}, {pipeline_mode = #tpu.pipeline_mode<synchronous>, transform_indices = @transform_3, window_bounds = array<i64: 128, 10>}, {pipeline_mode = #tpu.pipeline_mode<synchronous>, transform_indices = @transform_4, window_bounds = array<i64: 1, 10>}, {transform_indices = @transform_5, window_bounds = array<i64: 16, 10>}, {transform_indices = @transform_6, window_bounds = array<i64: 16, 2>}, {transform_indices = @transform_7, window_bounds = array<i64: 1, 8, 128>}]} {
    %c0 = arith.constant 0 : index
    %c0_0 = arith.constant 0 : index
    %c0_1 = arith.constant 0 : index
    %0 = vector.load %arg1[%c0, %c0_0, %c0_1] : memref<18x16x72xbf16, #tpu.memory_space<vmem>>, vector<18x16x72xbf16>
    %cst = arith.constant 0.000000e+00 : f32
    %1 = vector.broadcast %cst : f32 to vector<256x128xf32>
    %2 = vector.extract_strided_slice %0 {offsets = [0, 0, 0], sizes = [16, 16, 72], strides = [1, 1, 1]} : vector<18x16x72xbf16> to vector<16x16x72xbf16>
    %3 = vector.shape_cast %2 : vector<16x16x72xbf16> to vector<256x72xbf16>
    %c0_2 = arith.constant 0 : index
    %c0_3 = arith.constant 0 : index
    %c0_4 = arith.constant 0 : index
    %4 = vector.load %arg2[%c0_2, %c0_3, %c0_4] : memref<3x72x128xbf16, #tpu.memory_space<vmem>>, vector<1x72x128xbf16>
    %5 = vector.shape_cast %4 : vector<1x72x128xbf16> to vector<72x128xbf16>
    %cst_5 = arith.constant dense<0.000000e+00> : vector<256x128xf32>
    %6 = tpu.matmul %3, %5, %cst_5 {dimension_numbers = #tpu.dot_dimension_numbers<[1], [0], [0], [1], [0, 0, 1, 1], [], []>} : vector<256x72xbf16>, vector<72x128xbf16>, vector<256x128xf32> -> vector<256x128xf32>
    %7 = arith.addf %1, %6 : vector<256x128xf32>
    %8 = vector.extract_strided_slice %0 {offsets = [1, 0, 0], sizes = [16, 16, 72], strides = [1, 1, 1]} : vector<18x16x72xbf16> to vector<16x16x72xbf16>
    %9 = vector.shape_cast %8 : vector<16x16x72xbf16> to vector<256x72xbf16>
    %c1 = arith.constant 1 : index
    %c0_6 = arith.constant 0 : index
    %c0_7 = arith.constant 0 : index
    %10 = vector.load %arg2[%c1, %c0_6, %c0_7] : memref<3x72x128xbf16, #tpu.memory_space<vmem>>, vector<1x72x128xbf16>
    %11 = vector.shape_cast %10 : vector<1x72x128xbf16> to vector<72x128xbf16>
    %cst_8 = arith.constant dense<0.000000e+00> : vector<256x128xf32>
    %12 = tpu.matmul %9, %11, %cst_8 {dimension_numbers = #tpu.dot_dimension_numbers<[1], [0], [0], [1], [0, 0, 1, 1], [], []>} : vector<256x72xbf16>, vector<72x128xbf16>, vector<256x128xf32> -> vector<256x128xf32>
    %13 = arith.addf %7, %12 : vector<256x128xf32>
    %14 = vector.extract_strided_slice %0 {offsets = [2, 0, 0], sizes = [16, 16, 72], strides = [1, 1, 1]} : vector<18x16x72xbf16> to vector<16x16x72xbf16>
    %15 = vector.shape_cast %14 : vector<16x16x72xbf16> to vector<256x72xbf16>
    %c2 = arith.constant 2 : index
    %c0_9 = arith.constant 0 : index
    %c0_10 = arith.constant 0 : index
    %16 = vector.load %arg2[%c2, %c0_9, %c0_10] : memref<3x72x128xbf16, #tpu.memory_space<vmem>>, vector<1x72x128xbf16>
    %17 = vector.shape_cast %16 : vector<1x72x128xbf16> to vector<72x128xbf16>
    %cst_11 = arith.constant dense<0.000000e+00> : vector<256x128xf32>
    %18 = tpu.matmul %15, %17, %cst_11 {dimension_numbers = #tpu.dot_dimension_numbers<[1], [0], [0], [1], [0, 0, 1, 1], [], []>} : vector<256x72xbf16>, vector<72x128xbf16>, vector<256x128xf32> -> vector<256x128xf32>
    %19 = arith.addf %13, %18 : vector<256x128xf32>
    %c0_12 = arith.constant 0 : index
    %c0_13 = arith.constant 0 : index
    %20 = vector.load %arg3[%c0_12, %c0_13] : memref<1x128xf32, #tpu.memory_space<vmem>>, vector<1x128xf32>
    %21 = vector.broadcast %20 : vector<1x128xf32> to vector<256x128xf32>
    %22 = arith.addf %19, %21 : vector<256x128xf32>
    %cst_14 = arith.constant 0.000000e+00 : f32
    %23 = vector.broadcast %cst_14 : f32 to vector<256x128xf32>
    %24 = arith.maximumf %22, %23 : vector<256x128xf32>
    %25 = vector.shape_cast %24 : vector<256x128xf32> to vector<16x16x128xf32>
    %cst_15 = arith.constant dense<0.000000e+00> : vector<16x128xf32>
    %26 = vector.multi_reduction <add>, %25, %cst_15 [0] : vector<16x16x128xf32> to vector<16x128xf32>
    %c0_16 = arith.constant 0 : index
    %c0_17 = arith.constant 0 : index
    %27 = vector.load %arg4[%c0_16, %c0_17] : memref<128x10xf32, #tpu.memory_space<vmem>>, vector<128x10xf32>
    %cst_18 = arith.constant dense<0.000000e+00> : vector<16x10xf32>
    %28 = tpu.matmul %26, %27, %cst_18 {dimension_numbers = #tpu.dot_dimension_numbers<[1], [0], [0], [1], [0, 0, 1, 1], [], []>} : vector<16x128xf32>, vector<128x10xf32>, vector<16x10xf32> -> vector<16x10xf32>
    %c0_19 = arith.constant 0 : index
    %c0_20 = arith.constant 0 : index
    %29 = vector.load %arg5[%c0_19, %c0_20] : memref<1x10xf32, #tpu.memory_space<vmem>>, vector<1x10xf32>
    %30 = vector.broadcast %29 : vector<1x10xf32> to vector<16x10xf32>
    %31 = arith.addf %28, %30 : vector<16x10xf32>
    %cst_21 = arith.constant dense<0xFF800000> : vector<16xf32>
    %32 = vector.multi_reduction <maximumf>, %31, %cst_21 [1] : vector<16x10xf32> to vector<16xf32>
    %33 = vector.shape_cast %32 : vector<16xf32> to vector<16x1xf32>
    %34 = vector.broadcast %33 : vector<16x1xf32> to vector<16x10xf32>
    %35 = arith.subf %31, %34 : vector<16x10xf32>
    %36 = math.exp %35 : vector<16x10xf32>
    %cst_22 = arith.constant dense<0.000000e+00> : vector<16xf32>
    %37 = vector.multi_reduction <add>, %36, %cst_22 [1] : vector<16x10xf32> to vector<16xf32>
    %38 = vector.shape_cast %37 : vector<16xf32> to vector<16x1xf32>
    %39 = math.log %38 : vector<16x1xf32>
    %40 = arith.addf %33, %39 : vector<16x1xf32>
    %c0_23 = arith.constant 0 : index
    %c0_24 = arith.constant 0 : index
    %41 = vector.load %arg6[%c0_23, %c0_24] : memref<16x10xf32, #tpu.memory_space<vmem>>, vector<16x10xf32>
    %42 = arith.mulf %31, %41 : vector<16x10xf32>
    %cst_25 = arith.constant dense<0.000000e+00> : vector<16xf32>
    %43 = vector.multi_reduction <add>, %42, %cst_25 [1] : vector<16x10xf32> to vector<16xf32>
    %44 = vector.shape_cast %43 : vector<16xf32> to vector<16x1xf32>
    %c0_26 = arith.constant 0 : index
    %c0_27 = arith.constant 0 : index
    %45 = vector.load %arg7[%c0_26, %c0_27] : memref<16x2xf32, #tpu.memory_space<vmem>>, vector<16x2xf32>
    %46 = arith.subf %40, %44 : vector<16x1xf32>
    %47 = vector.extract_strided_slice %45 {offsets = [0, 0], sizes = [16, 1], strides = [1, 1]} : vector<16x2xf32> to vector<16x1xf32>
    %48 = arith.mulf %46, %47 : vector<16x1xf32>
    %cst_28 = arith.constant dense<0.000000e+00> : vector<1xf32>
    %49 = vector.multi_reduction <add>, %48, %cst_28 [0] : vector<16x1xf32> to vector<1xf32>
    %50 = vector.shape_cast %49 : vector<1xf32> to vector<1x1xf32>
    %51 = vector.extract_strided_slice %45 {offsets = [0, 1], sizes = [16, 1], strides = [1, 1]} : vector<16x2xf32> to vector<16x1xf32>
    %52 = arith.mulf %40, %51 : vector<16x1xf32>
    %cst_29 = arith.constant dense<0.000000e+00> : vector<1xf32>
    %53 = vector.multi_reduction <add>, %52, %cst_29 [0] : vector<16x1xf32> to vector<1xf32>
    %54 = vector.shape_cast %53 : vector<1xf32> to vector<1x1xf32>
    %55 = tpu.iota {dimensions = array<i32: 1>} : vector<8x128xi32>
    %c0_i32 = arith.constant 0 : i32
    %56 = vector.broadcast %c0_i32 : i32 to vector<8x128xi32>
    %57 = arith.cmpi eq, %55, %56 : vector<8x128xi32>
    %c1_i32 = arith.constant 1 : i32
    %58 = vector.broadcast %c1_i32 : i32 to vector<8x128xi32>
    %59 = arith.cmpi eq, %55, %58 : vector<8x128xi32>
    %cst_30 = arith.constant 0.000000e+00 : f32
    %60 = vector.shape_cast %54 : vector<1x1xf32> to vector<1x1xf32>
    %61 = vector.broadcast %60 : vector<1x1xf32> to vector<8x128xf32>
    %62 = vector.broadcast %cst_30 : f32 to vector<8x128xf32>
    %63 = arith.select %59, %61, %62 : vector<8x128xi1>, vector<8x128xf32>
    %64 = vector.shape_cast %50 : vector<1x1xf32> to vector<1x1xf32>
    %65 = vector.broadcast %64 : vector<1x1xf32> to vector<8x128xf32>
    %66 = arith.select %57, %65, %63 : vector<8x128xi1>, vector<8x128xf32>
    %67 = vector.shape_cast %66 : vector<8x128xf32> to vector<1x8x128xf32>
    %c0_31 = arith.constant 0 : index
    %c0_32 = arith.constant 0 : index
    %c0_33 = arith.constant 0 : index
    %68 = vector.load %arg8[%c0_31, %c0_32, %c0_33] : memref<1x8x128xf32, #tpu.memory_space<vmem>>, vector<1x8x128xf32>
    tpu.vector_store %arg8[%c0_31, %c0_32, %c0_33], %67 {strides = array<i32>} : memref<1x8x128xf32, #tpu.memory_space<vmem>>, vector<1x8x128xf32>,
    return
  }
  func.func @transform_0(%arg0: i32) -> (i32, i32, i32) {
    %c0_i32 = arith.constant 0 : i32
    %c0_i32_0 = arith.constant 0 : i32
    %c0_i32_1 = arith.constant 0 : i32
    return %c0_i32, %arg0, %c0_i32_0 : i32, i32, i32
  }
  func.func @transform_1(%arg0: i32) -> (i32, i32, i32) {
    %c0_i32 = arith.constant 0 : i32
    %c0_i32_0 = arith.constant 0 : i32
    %c0_i32_1 = arith.constant 0 : i32
    %c0_i32_2 = arith.constant 0 : i32
    return %c0_i32, %c0_i32_0, %c0_i32_1 : i32, i32, i32
  }
  func.func @transform_2(%arg0: i32) -> (i32, i32) {
    %c0_i32 = arith.constant 0 : i32
    %c0_i32_0 = arith.constant 0 : i32
    %c0_i32_1 = arith.constant 0 : i32
    return %c0_i32, %c0_i32_0 : i32, i32
  }
  func.func @transform_3(%arg0: i32) -> (i32, i32) {
    %c0_i32 = arith.constant 0 : i32
    %c0_i32_0 = arith.constant 0 : i32
    %c0_i32_1 = arith.constant 0 : i32
    return %c0_i32, %c0_i32_0 : i32, i32
  }
  func.func @transform_4(%arg0: i32) -> (i32, i32) {
    %c0_i32 = arith.constant 0 : i32
    %c0_i32_0 = arith.constant 0 : i32
    %c0_i32_1 = arith.constant 0 : i32
    return %c0_i32, %c0_i32_0 : i32, i32
  }
  func.func @transform_5(%arg0: i32) -> (i32, i32) {
    %c0_i32 = arith.constant 0 : i32
    %c0_i32_0 = arith.constant 0 : i32
    return %arg0, %c0_i32 : i32, i32
  }
  func.func @transform_6(%arg0: i32) -> (i32, i32) {
    %c0_i32 = arith.constant 0 : i32
    %c0_i32_0 = arith.constant 0 : i32
    return %arg0, %c0_i32 : i32, i32
  }
  func.func @transform_7(%arg0: i32) -> (i32, i32, i32) {
    %c0_i32 = arith.constant 0 : i32
    %c0_i32_0 = arith.constant 0 : i32
    %c0_i32_1 = arith.constant 0 : i32
    return %arg0, %c0_i32, %c0_i32_0 : i32, i32, i32
  }
}

</mosaic_0001>

<bundles_post_ra>
// kernel: main_model_forward.1
= control target key start
LH: loop header
LB: loop body
LE: loop exit
PB: predicated region body
PF: predicated region fallthrough
CT: control target
= control target key end

     0   :  { %s2289_s24 = smov 0   ;;  %s2291_s25 = smov 0   ;;  %s2591_s0 = inlined_call_operand.vmem [shape: bf16[18,32,72], index: 0, kind: input, shape index: {}]   ;;  %s2592_s1 = inlined_call_operand.vmem [shape: bf16[3,72,128], index: 1, kind: input, shape index: {}]   ;;  %s2593_s2 = inlined_call_operand.vmem [shape: f32[1,128], index: 2, kind: input, shape index: {}]   ;;  %s2594_s3 = inlined_call_operand.vmem [shape: f32[128,10], index: 3, kind: input, shape index: {}]   ;;  %s2595_s4 = inlined_call_operand.vmem [shape: f32[1,10], index: 4, kind: input, shape index: {}]   ;;  %s2596_s5 = inlined_call_operand.vmem [shape: f32[32,10], index: 5, kind: input, shape index: {}]   ;;  %s2597_s6 = inlined_call_operand.vmem [shape: f32[32,2], index: 6, kind: input, shape index: {}]   ;;  %s2598_s7 = inlined_call_operand.vmem [shape: f32[2,8,128], index: 7, kind: output, shape index: {}]  }
   0x1   :  { %s2293_s26 = smov 0  }
   0x2 LB: > { %s2305_s27 = sadd.s32 4294967295, %s2245_s26   ;;  %s2308_s28 = sadd.s32 1, %s2245_s26   ;;  %s2245_s26 = sphi %s2293_s26, %s2601_s26   ;;  %s2241_s25 = sphi %s2291_s25, %s2600_s25   ;;  %s2237_s24 = sphi %s2289_s24, %s2599_s24  }
   0x3   : > { %s21_s29 = ssub.s32 %s2245_s26, %s2308_s28  ;;  %s24_s30 = sadd.s32 1, %s2241_s25 }
   0x4   : > { %p22_p0 = scmp.eq.s32.totalorder %s21_s29, 0  ;;  %p31_p1 = scmp.ne.s32.totalorder %s2241_s25, %s2237_s24 }
   0x5   : > { %p32_p2 = scmp.eq.s32.totalorder %s2245_s26, 0  ;;  %p1686_p4 = scmp.ge.s32.totalorder %s2245_s26, 2 }
   0x6   : > { %s2317_s8 = scalar_select %p22_p0, %s2241_s25, %s24_s30  }
   0x7   : > { %p33_p3 = por %p32_p2, %p31_p1  ;;  %231 = sbr.rel (%p1686_p4) target bundleno = 27 (0x1b), region = 32 }
   0xe   : > { %234 = sbr.rel (!%p33_p3) target bundleno = 27 (0x1b), region = 36  ;;  %s236_s9 = sand.u32 (%p33_p3), 1, %s2241_s25  }
   0xf   : > { %s1798_s10 = sshll.u32 (%p33_p3), %s2245_s26, 3  ;;  %s2151_s11 = smul.u32 (%p33_p3), 144, %s236_s9 }
  0x10   : > { %s2325_s14 = scalar_lea.vmem (%p33_p3), %s2591_s0, %s1798_s10 }
  0x11   : > { %v257_v0 = vld [vmem:[%s2325_s14] sm:$0xff] (%p33_p3)   ;;  %v261_v1 = vld [vmem:[%s2325_s14 + $0x10] sm:$0xff] (%p33_p3)   ;;  %s238_s15 = scalar_lea.vmem (%p33_p3), [#allocation2], %s2151_s11 }
  0x12   : > { %v265_v2 = vld [vmem:[%s2325_s14 + $0x20] sm:$0xff] (%p33_p3)   ;;  %v269_v3 = vld [vmem:[%s2325_s14 + $0x30] sm:$0xff] (%p33_p3)   ;;  %258 = vst [vmem:[%s238_s15] sm:$0xff] (%p33_p3), %v257_v0   ;;  %262 = vst [vmem:[%s238_s15 + $0x8] sm:$0xff] (%p33_p3), %v261_v1  }
  0x13   : > { %v273_v4 = vld [vmem:[%s2325_s14 + $0x40] sm:$0xff] (%p33_p3)   ;;  %v277_v5 = vld [vmem:[%s2325_s14 + $0x50] sm:$0xff] (%p33_p3)   ;;  %266 = vst [vmem:[%s238_s15 + $0x10] sm:$0xff] (%p33_p3), %v265_v2   ;;  %270 = vst [vmem:[%s238_s15 + $0x18] sm:$0xff] (%p33_p3), %v269_v3  }
  0x14   : > { %274 = vst [vmem:[%s238_s15 + $0x20] sm:$0xff] (%p33_p3), %v273_v4   ;;  %278 = vst [vmem:[%s238_s15 + $0x28] sm:$0xff] (%p33_p3), %v277_v5   ;;  %v281_v6 = vld [vmem:[%s2325_s14 + $0x60] sm:$0xff] (%p33_p3)   ;;  %v285_v7 = vld [vmem:[%s2325_s14 + $0x70] sm:$0xff] (%p33_p3)  }
  0x15   : > { %v289_v8 = vld [vmem:[%s2325_s14 + $0x80] sm:$0xff]   ;;  %282 = vst [vmem:[%s238_s15 + $0x30] sm:$0xff] %v281_v6   ;;  %286 = vst [vmem:[%s238_s15 + $0x38] sm:$0xff] %v285_v7   ;;  %v293_v9 = vld [vmem:[%s2325_s14 + $0x90] sm:$0xff]  }
  0x16   : > { %290 = vst [vmem:[%s238_s15 + $0x40] sm:$0xff] %v289_v8   ;;  %v297_v10 = vld [vmem:[%s2325_s14 + $0xa0] sm:$0xff]   ;;  %v301_v11 = vld [vmem:[%s2325_s14 + $0xb0] sm:$0xff]   ;;  %294 = vst [vmem:[%s238_s15 + $0x48] sm:$0xff] %v293_v9  }
  0x17   : > { %298 = vst [vmem:[%s238_s15 + $0x50] sm:$0xff] %v297_v10   ;;  %302 = vst [vmem:[%s238_s15 + $0x58] sm:$0xff] %v301_v11   ;;  %v305_v12 = vld [vmem:[%s2325_s14 + $0xc0] sm:$0xff]   ;;  %v309_v13 = vld [vmem:[%s2325_s14 + $0xd0] sm:$0xff]  }
  0x18   : > { %v313_v14 = vld [vmem:[%s2325_s14 + $0xe0] sm:$0xff]   ;;  %306 = vst [vmem:[%s238_s15 + $0x60] sm:$0xff] %v305_v12   ;;  %310 = vst [vmem:[%s238_s15 + $0x68] sm:$0xff] %v309_v13   ;;  %v317_v15 = vld [vmem:[%s2325_s14 + $0xf0] sm:$0xff]  }
  0x19   : > { %314 = vst [vmem:[%s238_s15 + $0x70] sm:$0xff] %v313_v14   ;;  %v321_v16 = vld [vmem:[%s2325_s14 + $0x100] sm:$0xff]   ;;  %v325_v17 = vld [vmem:[%s2325_s14 + $0x110] sm:$0xff]   ;;  %318 = vst [vmem:[%s238_s15 + $0x78] sm:$0xff] %v317_v15  }
  0x1a   : > { %322 = vst [vmem:[%s238_s15 + $0x80] sm:$0xff] %v321_v16   ;;  %326 = vst [vmem:[%s238_s15 + $0x88] sm:$0xff] %v325_v17  }
  0x1b PF: > { %p1689_p5 = scmp.ge.s32.totalorder %s2245_s26, 1  ;;  %p440_p6 = scmp.lt.s32.totalorder %s2245_s26, 3 }
  0x1d   : > { %p441_p7 = pnand %p1689_p5, %p440_p6 }
  0x1e   : > { %v2182_v18 = vld [vmem:[%s2592_s1 + $0x24] sm:$0xff] (!%p441_p7)   ;;  %s447_s20 = sand.u32 (!%p441_p7), 1, %s2237_s24   ;;  %v2184_v20 = vld [vmem:[%s2592_s1 + $0x2c] sm:$0xff] (!%p441_p7)   ;;  %v2186_v22 = vld [vmem:[%s2592_s1 + $0x34] sm:$0xff] (!%p441_p7)   ;;  %vm667_vm0 = vcmask (!%p441_p7), 588800   ;;  %vm716_vm1 = vcmask (!%p441_p7), 1043456  }
  0x1f   : > { %444 = sbr.rel (%p441_p7) target bundleno = 1056 (0x420), region = 85  ;;  %v2183_v19 = vld [vmem:[%s2592_s1] sm:$0xff] (!%p441_p7)   ;;  %1880 = vmatprep.subr.bf16.mxu1 (!%p441_p7), %v2182_v18  ;;  %v2185_v21 = vld [vmem:[%s2592_s1 + $0x8] sm:$0xff] (!%p441_p7)   ;;  %v2187_v23 = vld [vmem:[%s2592_s1 + $0x10] sm:$0xff] (!%p441_p7)   ;;  %s1690_s30 = sshll.u32 (!%p441_p7), %s2305_s27, 1  ;;  %vm1520_vm2 = vcmask (!%p441_p7), 80896  }
  0x20   : > { %1922 = vmatprep.subr.bf16.mxu0 (!%p441_p7), %v2183_v19  ;;  %1881 = vmatpush3.bf16.msra.mxu1 (!%p441_p7), %v2182_v18  ;;  %s2152_s29 = smul.u32 (!%p441_p7), 144, %s447_s20  ;;  %v2188_v24 = vld [vmem:[%s2592_s1 + $0x3c] sm:$0xff] (!%p441_p7)   ;;  %v2190_v28 = vld [vmem:[%s2592_s1 + $0x44] ss:$0 sps:$4 sm:$0xff] (!%p441_p7)   ;;  %v2195_v32 = vld [vmem:[%s2592_s1 + $0x48] sm:$0xff] (!%p441_p7)   ;;  %p489_p8 = scmp.lt.s32.totalorder (!%p441_p7), %s1690_s30, 3 }
  0x21   : > { %1923 = vmatpush3.bf16.msra.mxu0 (!%p441_p7), %v2183_v19  ;;  %1882 = vmatprep.subr.bf16.mxu1 (!%p441_p7), %v2184_v20  ;;  %v2189_v25 = vld [vmem:[%s2592_s1 + $0x18] sm:$0xff] (!%p441_p7)   ;;  %v2191_v29 = vld [vmem:[%s2592_s1 + $0x20] ss:$0 sps:$4 sm:$0xff] (!%p441_p7)   ;;  %v718_v30 = vsel (!%p441_p7), %vm716_vm1, %v2190_v28, 0  ;;  %v2198_v35 = vld [vmem:[%s2592_s1 + $0x50] sm:$0xff] (!%p441_p7)   ;;  %vm1573_vm3 = vcmask (!%p441_p7), 15368  }
  0x22   : > { %1924 = vmatprep.subr.bf16.mxu0 (!%p441_p7), %v2185_v21  ;;  %s2372_s15 = scalar_lea.vmem (!%p441_p7), [#allocation2], %s2152_s29  ;;  %v917_v31 = vsel (!%p441_p7), %vm716_vm1, %v2191_v29, 0  ;;  %v2199_v36 = vld [vmem:[%s2592_s1 + $0x58] sm:$0xff] (!%p441_p7)   ;;  %v2202_v39 = vld [vmem:[%s2592_s1 + $0x60] sm:$0xff] (!%p441_p7)   ;;  %v2203_v40 = vld [vmem:[%s2592_s1 + $0x68] ss:$0 sps:$4 sm:$0xff] (!%p441_p7)  }
  0x23   : > { %v2192_v26 = vld [vmem:[%s2372_s15 + $0x8] sm:$0xff] (!%p441_p7)   ;;  %v2193_v27 = vld [vmem:[%s2372_s15] sm:$0xff] (!%p441_p7)   ;;  %v2194_v33 = vld [vmem:[%s2372_s15 + $0x10] sm:$0xff] (!%p441_p7)   ;;  %v1126_v43 = vsel (!%p441_p7), %vm716_vm1, %v2203_v40, 0  ;;  %vm1561_vm4 = vcmask (!%p441_p7), 7168   ;;  %p500_p9 = scmp.lt.s32.totalorder (!%p441_p7), %s2305_s27, 1 }
  0x24   : > { %1883 = vmatpush3.bf16.msra.mxu1 (!%p441_p7), %v2184_v20  ;;  %1890 = vmatprep.mubr.msk.bf16.mxu1 (!%p441_p7), %vm667_vm0, %v2192_v26  ;;  %v2196_v34 = vld [vmem:[%s2372_s15 + $0x18] sm:$0xff] (!%p441_p7)   ;;  %v2197_v37 = vld [vmem:[%s2372_s15 + $0x20] sm:$0xff] (!%p441_p7)   ;;  %v2200_v38 = vld [vmem:[%s2372_s15 + $0x28] sm:$0xff] (!%p441_p7)  }
  0x25   : > { %1925 = vmatpush3.bf16.msra.mxu0 (!%p441_p7), %v2185_v21  ;;  %1884 = vmatprep.subr.bf16.mxu1 (!%p441_p7), %v2186_v22  ;;  %v2201_v41 = vld [vmem:[%s2372_s15 + $0x30] sm:$0xff] (!%p441_p7)   ;;  %v2204_v42 = vld [vmem:[%s2372_s15 + $0x38] sm:$0xff] (!%p441_p7)   ;;  %v2205_v44 = vld [vmem:[%s2372_s15 + $0x40] sm:$0xff] (!%p441_p7)  }
  0x26   : > { %1926 = vmatprep.subr.bf16.mxu0 %v2187_v23  ;;  %1932 = vmatprep.mubr.msk.bf16.mxu0 %vm667_vm0, %v2193_v27  ;;  %v2206_v45 = vld [vmem:[%s2372_s15 + $0x48] sm:$0xff]   ;;  %v2207_v46 = vld [vmem:[%s2372_s15 + $0x50] sm:$0xff]   ;;  %v2208_v47 = vld [vmem:[%s2372_s15 + $0x58] sm:$0xff]   ;;  %s2603_s30 = smov (!%p489_p8, %s1690_s30), 3  ;;  %s2605_s27 = smov (!%p500_p9, %s2305_s27), 1 }
  0x27   : > { %v2209_v48 = vld [vmem:[%s2372_s15 + $0x60] sm:$0xff]   ;;  %v2210_v49 = vld [vmem:[%s2372_s15 + $0x68] sm:$0xff]   ;;  %v2211_v50 = vld [vmem:[%s2372_s15 + $0x70] sm:$0xff]   ;;  %s1691_s10 = sshll.u32 %s2603_s30, 3  ;;  %s1694_s17 = sshll.u32 %s2605_s27, 3 }
  0x28   : > { %1885 = vmatpush3.bf16.msra.mxu1 %v2186_v22  ;;  %v2212_v51 = vld [vmem:[%s2372_s15 + $0x78] sm:$0xff]   ;;  %v2213_v52 = vld [vmem:[%s2372_s15 + $0x80] sm:$0xff]   ;;  %v2214_v53 = vld [vmem:[%s2372_s15 + $0x88] sm:$0xff]   ;;  %s492_s13 = scalar_lea.vmem %s2596_s5, %s1691_s10  ;;  %s498_s16 = scalar_lea.vmem %s2597_s6, %s1691_s10 }
  0x29   : > { %1927 = vmatpush3.bf16.msra.mxu0 %v2187_v23  ;;  %1886 = vmatprep.subr.bf16.mxu1 %v2188_v24  ;;  %v1422_v54 = vld [vmem:[%s2594_s3] sm:$0xff]  ;;  %v1423_v55 = vld [vmem:[%s2594_s3 + $0x8] sm:$0xff]  ;;  %v1424_v56 = vld [vmem:[%s2594_s3 + $0x10] sm:$0xff]  ;;  %s503_s20 = scalar_lea.vmem %s2598_s7, %s1694_s17 }
  0x2a   : > { %1928 = vmatprep.subr.bf16.mxu0 %v2189_v25  ;;  %v2041_v57 = vpack.c.bf16 %v1423_v55, %v1422_v54  ;;  %v1425_v58 = vld [vmem:[%s2594_s3 + $0x18] sm:$0xff]  ;;  %v1426_v60 = vld [vmem:[%s2594_s3 + $0x20] sm:$0xff]  ;;  %v1427_v61 = vld [vmem:[%s2594_s3 + $0x28] sm:$0xff] }
  0x2b   : > { %v2045_v59 = vpack.c.bf16 %v1425_v58, %v1424_v56  ;;  %v2049_v62 = vpack.c.bf16 %v1427_v61, %v1426_v60  ;;  %v1428_v63 = vld [vmem:[%s2594_s3 + $0x30] sm:$0xff]  ;;  %v1429_v0 = vld [vmem:[%s2594_s3 + $0x38] sm:$0xff]  ;;  %v1430_v2 = vld [vmem:[%s2594_s3 + $0x40] sm:$0xff] }
  0x2c   : > { %1887 = vmatpush3.bf16.msra.mxu1 %v2188_v24  ;;  %v2053_v1 = vpack.c.bf16 %v1429_v0, %v1428_v63  ;;  %v1431_v3 = vld [vmem:[%s2594_s3 + $0x48] sm:$0xff]  ;;  %v1432_v5 = vld [vmem:[%s2594_s3 + $0x50] sm:$0xff]  ;;  %v1433_v6 = vld [vmem:[%s2594_s3 + $0x58] sm:$0xff] }
  0x2d   : > { %1929 = vmatpush3.bf16.msra.mxu0 %v2189_v25  ;;  %2147 = vmatprep.subr.msk.bf16.mxu1 %vm716_vm1, %v2190_v28  ;;  %v2057_v4 = vpack.c.bf16 %v1431_v3, %v1430_v2  ;;  %v2061_v7 = vpack.c.bf16 %v1433_v6, %v1432_v5  ;;  %v1434_v8 = vld [vmem:[%s2594_s3 + $0x60] sm:$0xff]  ;;  %v1435_v9 = vld [vmem:[%s2594_s3 + $0x68] sm:$0xff]  ;;  %v1436_v11 = vld [vmem:[%s2594_s3 + $0x70] sm:$0xff] }
  0x2e   : > { %2148 = vmatprep.subr.msk.bf16.mxu0 %vm716_vm1, %v2191_v29  ;;  %v2065_v10 = vpack.c.bf16 %v1435_v9, %v1434_v8  ;;  %v1437_v12 = vld [vmem:[%s2594_s3 + $0x78] sm:$0xff]  ;;  %v2519_v27 = vld [vmem:[%s2593_s2] ss:$0 sm:$0xff] }
  0x2f   : > { %v2069_v13 = vpack.c.bf16 %v1437_v12, %v1436_v11 }
  0x30   : > { %1889 = vmatpush3.bf16.msra.mxu1 %v718_v30 }
  0x31   : > { %1931 = vmatpush3.bf16.msra.mxu0 %v917_v31  ;;  %2073 = vmatprep.subr.bf16.mxu1 %v2183_v19 }
  0x32   : > { %1964 = vmatprep.subr.bf16.mxu0 %v2195_v32 }
  0x33   : > { %1891 = vmatmul.mubr.msk.bf16.vlgmr.msra.gmra.mrb[0].mxu1 %vm667_vm0, %v2194_v33 }
  0x34   : > { %1933 = vmatmul.mubr.msk.bf16.vlgmr.msra.gmra.mrb[0].mxu0 %vm667_vm0, %v2192_v26  ;;  %2078 = vmatpush3.bf16.msra.mxu1 %v2183_v19 }
  0x35   : > { %1965 = vmatpush3.bf16.msra.mxu0 %v2195_v32  ;;  %1894 = vmatprep.mubr.msk.bf16.mxu1 %vm667_vm0, %v2196_v34 }
  0x36   : > { %1936 = vmatprep.mubr.msk.bf16.mxu0 %vm667_vm0, %v2194_v33  ;;  %1966 = vmatprep.subr.bf16.mxu0 %v2198_v35 }
  0x37   : > { %2074 = vmatprep.subr.bf16.mxu1 %v2185_v21 }
  0x38   : > { %2079 = vmatpush3.bf16.msra.mxu1 %v2185_v21 }
  0x39   : > { %1967 = vmatpush3.bf16.msra.mxu0 %v2198_v35  ;;  %2075 = vmatprep.subr.bf16.mxu1 %v2187_v23 }
  0x3a   : > { %1968 = vmatprep.subr.bf16.mxu0 %v2199_v36 }
  0x3b   : > { %1895 = vmatmul.mubr.msk.bf16.gmra.mrb[4].mxu1 %vm667_vm0, %v2197_v37 }
  0x3c   : > { %1937 = vmatmul.mubr.msk.bf16.gmra.mrb[4].mxu0 %vm667_vm0, %v2196_v34  ;;  %1898 = vmatprep.mubr.msk.bf16.mxu1 %vm667_vm0, %v2200_v38 }
  0x3d   : > { %1969 = vmatpush3.bf16.msra.mxu0 %v2199_v36  ;;  %1940 = vmatprep.mubr.msk.bf16.mxu0 %vm667_vm0, %v2197_v37 }
  0x3e   : > { %1970 = vmatprep.subr.bf16.mxu0 %v2202_v39  ;;  %2080 = vmatpush3.bf16.msra.mxu1 %v2187_v23 }
  0x3f   : > { %2076 = vmatprep.subr.bf16.mxu1 %v2189_v25 }
  0x41   : > { %1971 = vmatpush3.bf16.msra.mxu0 %v2202_v39 }
  0x42   : > { %2150 = vmatprep.subr.msk.bf16.mxu0 %vm716_vm1, %v2203_v40  ;;  %2081 = vmatpush3.bf16.msra.mxu1 %v2189_v25 }
  0x43   : > { %1899 = vmatmul.mubr.msk.bf16.gmra.mrb[8].mxu1 %vm667_vm0, %v2201_v41  ;;  %2149 = vmatprep.subr.msk.bf16.mxu1 %vm716_vm1, %v2191_v29 }
  0x44   : > { %1941 = vmatmul.mubr.msk.bf16.gmra.mrb[8].mxu0 %vm667_vm0, %v2200_v38  ;;  %1902 = vmatprep.mubr.msk.bf16.mxu1 %vm667_vm0, %v2204_v42 }
  0x45   : > { %1973 = vmatpush3.bf16.msra.mxu0 %v1126_v43  ;;  %1974 = vmatprep.mubr.msk.bf16.mxu0 %vm667_vm0, %v2194_v33 }
  0x46   : > { %2082 = vmatpush3.bf16.msra.mxu1 %v917_v31  ;;  %2042 = vmatprep.subr.bf16.mxu0 %v2041_v57 }
  0x4b   : > { %1903 = vmatmul.mubr.msk.bf16.gmra.mrb[12].mxu1 %vm667_vm0, %v2205_v44 }
  0x4c   : > { %1975 = vmatmul.mubr.msk.bf16.vlgmr.msra.gmra.mrb[0].mxu0 %vm667_vm0, %v2196_v34  ;;  %1906 = vmatprep.mubr.msk.bf16.mxu1 %vm667_vm0, %v2206_v45 }
  0x4d   : > { %1978 = vmatprep.mubr.msk.bf16.mxu0 %vm667_vm0, %v2197_v37  ;;  %2044 = vmatpush3.bf16.msra.mxu0 %v2041_v57 }
  0x4e   : > { %2046 = vmatprep.subr.bf16.mxu0 %v2045_v59 }
  0x51   : > { %2048 = vmatpush3.bf16.msra.mxu0 %v2045_v59 }
  0x52   : > { %2050 = vmatprep.subr.bf16.mxu0 %v2049_v62 }
  0x53   : > { %1907 = vmatmul.mubr.msk.bf16.gmra.mrb[16].mxu1 %vm667_vm0, %v2207_v46 }
  0x54   : > { %1979 = vmatmul.mubr.msk.bf16.gmra.mrb[4].mxu0 %vm667_vm0, %v2200_v38  ;;  %1910 = vmatprep.mubr.msk.bf16.mxu1 %vm667_vm0, %v2208_v47 }
  0x55   : > { %1982 = vmatprep.mubr.msk.bf16.mxu0 %vm667_vm0, %v2201_v41  ;;  %2052 = vmatpush3.bf16.msra.mxu0 %v2049_v62 }
  0x56   : > { %2054 = vmatprep.subr.bf16.mxu0 %v2053_v1 }
  0x59   : > { %2056 = vmatpush3.bf16.msra.mxu0 %v2053_v1 }
  0x5a   : > { %2058 = vmatprep.subr.bf16.mxu0 %v2057_v4 }
  0x5b   : > { %1911 = vmatmul.mubr.msk.bf16.gmra.mrb[20].mxu1 %vm667_vm0, %v2209_v48 }
  0x5c   : > { %1983 = vmatmul.mubr.msk.bf16.gmra.mrb[8].mxu0 %vm667_vm0, %v2204_v42  ;;  %1914 = vmatprep.mubr.msk.bf16.mxu1 %vm667_vm0, %v2210_v49 }
  0x5d   : > { %1986 = vmatprep.mubr.msk.bf16.mxu0 %vm667_vm0, %v2205_v44  ;;  %2060 = vmatpush3.bf16.msra.mxu0 %v2057_v4 }
  0x5e   : > { %2062 = vmatprep.subr.bf16.mxu0 %v2061_v7 }
  0x61   : > { %2064 = vmatpush3.bf16.msra.mxu0 %v2061_v7 }
  0x62   : > { %2066 = vmatprep.subr.bf16.mxu0 %v2065_v10 }
  0x63   : > { %1915 = vmatmul.mubr.msk.bf16.gmra.mrb[24].mxu1 %vm667_vm0, %v2211_v50 }
  0x64   : > { %1918 = vmatprep.mubr.msk.bf16.mxu1 %vm667_vm0, %v2212_v51  ;;  %1987 = vmatmul.mubr.msk.bf16.gmra.mrb[12].mxu0 %vm667_vm0, %v2206_v45 }
  0x65   : > { %1990 = vmatprep.mubr.msk.bf16.mxu0 %vm667_vm0, %v2207_v46  ;;  %2068 = vmatpush3.bf16.msra.mxu0 %v2065_v10 }
  0x66   : > { %2070 = vmatprep.subr.bf16.mxu0 %v2069_v13 }
  0x69   : > { %2072 = vmatpush3.bf16.msra.mxu0 %v2069_v13 }
  0x6b   : > { %1919 = vmatmul.mubr.msk.bf16.gmra.mrb[28].mxu1 %vm667_vm0, %v2213_v52 }
  0x6c   : > { %1944 = vmatprep.mubr.msk.bf16.mxu1 %vm667_vm0, %v2201_v41  ;;  %1991 = vmatmul.mubr.msk.bf16.gmra.mrb[16].mxu0 %vm667_vm0, %v2208_v47 }
  0x6d   : > { %1994 = vmatprep.mubr.msk.bf16.mxu0 %vm667_vm0, %v2209_v48 }
  0x73   : > { %1945 = vmatmul.mubr.msk.bf16.vlgmr.msra.gmra.mrb[12].mxu1 %vm667_vm0, %v2204_v42 }
  0x74   : > { %1948 = vmatprep.mubr.msk.bf16.mxu1 %vm667_vm0, %v2205_v44  ;;  %1995 = vmatmul.mubr.msk.bf16.gmra.mrb[20].mxu0 %vm667_vm0, %v2210_v49 }
  0x75   : > { %1998 = vmatprep.mubr.msk.bf16.mxu0 %vm667_vm0, %v2211_v50 }
  0x7b   : > { %1949 = vmatmul.mubr.msk.bf16.gmra.mrb[16].mxu1 %vm667_vm0, %v2206_v45 }
  0x7c   : > { %1952 = vmatprep.mubr.msk.bf16.mxu1 %vm667_vm0, %v2207_v46  ;;  %1999 = vmatmul.mubr.msk.bf16.gmra.mrb[24].mxu0 %vm667_vm0, %v2212_v51 }
  0x7d   : > { %2002 = vmatprep.mubr.msk.bf16.mxu0 %vm667_vm0, %v2213_v52 }
  0x83   : > { %1953 = vmatmul.mubr.msk.bf16.gmra.mrb[20].mxu1 %vm667_vm0, %v2208_v47 }
  0x84   : > { %1956 = vmatprep.mubr.msk.bf16.mxu1 %vm667_vm0, %v2209_v48  ;;  %2003 = vmatmul.mubr.msk.bf16.gmra.mrb[28].mxu0 %vm667_vm0, %v2214_v53 }
  0x8b   : > { %1957 = vmatmul.mubr.msk.bf16.gmra.mrb[24].mxu1 %vm667_vm0, %v2210_v49 }
  0x8c   : > { %1960 = vmatprep.mubr.msk.bf16.mxu1 %vm667_vm0, %v2211_v50 }
  0x93   : > { %1961 = vmatmul.mubr.msk.bf16.gmra.mrb[28].mxu1 %vm667_vm0, %v2212_v51 }
 0x106   : > { %v1892_v14 = vpop.f32.mrb[0].mxu1 }
 0x107   : > { %v754_v15 = vpop.f32.mrb[1].mxu1 }
 0x108   : > { %v1893_v16 = vpop.f32.mrb[2].mxu1 }
 0x109   : > { %v757_v17 = vpop.f32.mrb[3].mxu1 }
 0x10e   : > { %v1896_v18 = vpop.f32.mrb[4].mxu1 }
 0x10f   : > { %v770_v19 = vpop.f32.mrb[5].mxu1 }
 0x110   : > { %v1897_v20 = vpop.f32.mrb[6].mxu1 }
 0x111   : > { %v773_v21 = vpop.f32.mrb[7].mxu1 }
 0x116   : > { %v1900_v22 = vpop.f32.mrb[8].mxu1 }
 0x117   : > { %v786_v23 = vpop.f32.mrb[9].mxu1 }
 0x118   : > { %v1901_v24 = vpop.f32.mrb[10].mxu1 }
 0x119   : > { %v789_v25 = vpop.f32.mrb[11].mxu1 }
 0x11f   : > { %v1976_v26 = vpop.f32.mrb[0].mxu0 }
 0x120   : > { %v2083_v28 = vadd.f32 %v1976_v26, %v1892_v14  ;;  %v1162_v29 = vpop.f32.mrb[1].mxu0 }
 0x121   : > { %v2084_v30 = vadd.f32 %v1162_v29, %v754_v15  ;;  %v1977_v31 = vpop.f32.mrb[2].mxu0 }
 0x122   : > { %v1330_v32 = vadd.f32 %v2083_v28, %v2519_v27  ;;  %v2085_v33 = vadd.f32 %v1977_v31, %v1893_v16  ;;  %v1165_v34 = vpop.f32.mrb[3].mxu0 }
 0x123   : > { %v1328_v35 = vadd.f32 %v2084_v30, %v2519_v27  ;;  %v2086_v36 = vadd.f32 %v1165_v34, %v757_v17 }
 0x124   : > { %v1362_v37 = vmax.f32 %v1330_v32, 0.0  ;;  %v1331_v38 = vadd.f32 %v2085_v33, %v2519_v27 }
 0x125   : > { %v1360_v39 = vmax.f32 %v1328_v35, 0.0  ;;  %v1329_v40 = vadd.f32 %v2086_v36, %v2519_v27 }
 0x126   : > { %v1363_v41 = vmax.f32 %v1331_v38, 0.0 }
 0x127   : > { %v1392_v42 = vadd.f32 %v1362_v37, %v1360_v39  ;;  %v1361_v43 = vmax.f32 %v1329_v40, 0.0  ;;  %v1980_v44 = vpop.f32.mrb[4].mxu0 }
 0x128   : > { %v2087_v45 = vadd.f32 %v1980_v44, %v1896_v18  ;;  %v1178_v46 = vpop.f32.mrb[5].mxu0 }
 0x129   : > { %v1407_v47 = vadd.f32 %v1363_v41, %v1361_v43  ;;  %v2088_v48 = vadd.f32 %v1178_v46, %v770_v19  ;;  %v1981_v49 = vpop.f32.mrb[6].mxu0 }
 0x12a   : > { %v2089_v50 = vadd.f32 %v1981_v49, %v1897_v20  ;;  %v1181_v51 = vpop.f32.mrb[7].mxu0  ;;  %v1334_v52 = vadd.f32 %v2087_v45, %v2519_v27 }
 0x12b   : > { %v1332_v53 = vadd.f32 %v2088_v48, %v2519_v27  ;;  %v2090_v54 = vadd.f32 %v1181_v51, %v773_v21 }
 0x12c   : > { %v1335_v56 = vadd.f32 %v2089_v50, %v2519_v27  ;;  %v1366_v58 = vmax.f32 %v1334_v52, 0.0 }
 0x12d   : > { %v1364_v55 = vmax.f32 %v1332_v53, 0.0  ;;  %v1333_v57 = vadd.f32 %v2090_v54, %v2519_v27 }
 0x12e   : > { %v1367_v0 = vmax.f32 %v1335_v56, 0.0 }
 0x12f   : > { %v1393_v59 = vadd.f32 %v1392_v42, %v1364_v55  ;;  %v1365_v60 = vmax.f32 %v1333_v57, 0.0  ;;  %v1984_v61 = vpop.f32.mrb[8].mxu0 }
 0x130   : > { %v2091_v62 = vadd.f32 %v1984_v61, %v1900_v22  ;;  %v1194_v63 = vpop.f32.mrb[9].mxu0 }
 0x131   : > { %v1408_v1 = vadd.f32 %v1407_v47, %v1365_v60  ;;  %v2092_v2 = vadd.f32 %v1194_v63, %v786_v23  ;;  %v1394_v3 = vadd.f32 %v1393_v59, %v1366_v58  ;;  %v1985_v4 = vpop.f32.mrb[10].mxu0 }
 0x132   : > { %v2093_v5 = vadd.f32 %v1985_v4, %v1901_v24  ;;  %v1197_v6 = vpop.f32.mrb[11].mxu0  ;;  %v1338_v7 = vadd.f32 %v2091_v62, %v2519_v27 }
 0x133   : > { %v1336_v8 = vadd.f32 %v2092_v2, %v2519_v27  ;;  %v2094_v9 = vadd.f32 %v1197_v6, %v789_v25  ;;  %v1409_v10 = vadd.f32 %v1408_v1, %v1367_v0 }
 0x134   : > { %v1339_v12 = vadd.f32 %v2093_v5, %v2519_v27  ;;  %v1370_v14 = vmax.f32 %v1338_v7, 0.0 }
 0x135   : > { %v1368_v11 = vmax.f32 %v1336_v8, 0.0  ;;  %v1337_v13 = vadd.f32 %v2094_v9, %v2519_v27 }
 0x136   : > { %v1371_v19 = vmax.f32 %v1339_v12, 0.0 }
 0x137   : > { %v1395_v15 = vadd.f32 %v1394_v3, %v1368_v11  ;;  %v1369_v16 = vmax.f32 %v1337_v13, 0.0  ;;  %v1988_v17 = vpop.f32.mrb[12].mxu0 }
 0x138   : > { %v1210_v18 = vpop.f32.mrb[13].mxu0 }
 0x139   : > { %v1410_v20 = vadd.f32 %v1409_v10, %v1369_v16  ;;  %v1989_v21 = vpop.f32.mrb[14].mxu0  ;;  %v1396_v22 = vadd.f32 %v1395_v15, %v1370_v14 }
 0x13a   : > { %v1213_v23 = vpop.f32.mrb[15].mxu0 }
 0x13b   : > { %v1411_v24 = vadd.f32 %v1410_v20, %v1371_v19 }
 0x13f   : > { %v1992_v26 = vpop.f32.mrb[16].mxu0 }
 0x140   : > { %v1226_v28 = vpop.f32.mrb[17].mxu0 }
 0x141   : > { %v1993_v25 = vpop.f32.mrb[18].mxu0 }
 0x142   : > { %v1229_v29 = vpop.f32.mrb[19].mxu0 }
 0x146   : > { %v1946_v30 = vpop.f32.mrb[12].mxu1 }
 0x147   : > { %v2095_v31 = vadd.f32 %v1988_v17, %v1946_v30  ;;  %v1001_v32 = vpop.f32.mrb[13].mxu1  ;;  %v1996_v33 = vpop.f32.mrb[20].mxu0 }
 0x148   : > { %v2096_v34 = vadd.f32 %v1210_v18, %v1001_v32  ;;  %v1947_v35 = vpop.f32.mrb[14].mxu1  ;;  %v1242_v36 = vpop.f32.mrb[21].mxu0 }
 0x149   : > { %v2097_v37 = vadd.f32 %v1989_v21, %v1947_v35  ;;  %v1004_v38 = vpop.f32.mrb[15].mxu1  ;;  %v1997_v39 = vpop.f32.mrb[22].mxu0  ;;  %v1342_v40 = vadd.f32 %v2095_v31, %v2519_v27 }
 0x14a   : > { %v1340_v41 = vadd.f32 %v2096_v34, %v2519_v27  ;;  %v2098_v42 = vadd.f32 %v1213_v23, %v1004_v38  ;;  %v1245_v43 = vpop.f32.mrb[23].mxu0 }
 0x14b   : > { %v1343_v45 = vadd.f32 %v2097_v37, %v2519_v27  ;;  %v1374_v47 = vmax.f32 %v1342_v40, 0.0 }
 0x14c   : > { %v1372_v44 = vmax.f32 %v1340_v41, 0.0  ;;  %v1341_v46 = vadd.f32 %v2098_v42, %v2519_v27 }
 0x14d   : > { %v1375_v54 = vmax.f32 %v1343_v45, 0.0 }
 0x14e   : > { %v1397_v48 = vadd.f32 %v1396_v22, %v1372_v44  ;;  %v1373_v49 = vmax.f32 %v1341_v46, 0.0  ;;  %v1950_v50 = vpop.f32.mrb[16].mxu1 }
 0x14f   : > { %v2099_v51 = vadd.f32 %v1992_v26, %v1950_v50  ;;  %v1017_v52 = vpop.f32.mrb[17].mxu1  ;;  %v2000_v53 = vpop.f32.mrb[24].mxu0 }
 0x150   : > { %v1412_v55 = vadd.f32 %v1411_v24, %v1373_v49  ;;  %v2100_v56 = vadd.f32 %v1226_v28, %v1017_v52  ;;  %v1398_v57 = vadd.f32 %v1397_v48, %v1374_v47  ;;  %v1951_v58 = vpop.f32.mrb[18].mxu1  ;;  %v1258_v59 = vpop.f32.mrb[25].mxu0 }
 0x151   : > { %v2101_v60 = vadd.f32 %v1993_v25, %v1951_v58  ;;  %v1020_v61 = vpop.f32.mrb[19].mxu1  ;;  %v2001_v62 = vpop.f32.mrb[26].mxu0  ;;  %v1346_v63 = vadd.f32 %v2099_v51, %v2519_v27 }
 0x152   : > { %v1344_v0 = vadd.f32 %v2100_v56, %v2519_v27  ;;  %v2102_v1 = vadd.f32 %v1229_v29, %v1020_v61  ;;  %v1413_v2 = vadd.f32 %v1412_v55, %v1375_v54  ;;  %v1261_v3 = vpop.f32.mrb[27].mxu0 }
 0x153   : > { %v1347_v5 = vadd.f32 %v2101_v60, %v2519_v27  ;;  %v1378_v7 = vmax.f32 %v1346_v63, 0.0 }
 0x154   : > { %v1376_v4 = vmax.f32 %v1344_v0, 0.0  ;;  %v1345_v6 = vadd.f32 %v2102_v1, %v2519_v27 }
 0x155   : > { %v1379_v14 = vmax.f32 %v1347_v5, 0.0 }
 0x156   : > { %v1399_v8 = vadd.f32 %v1398_v57, %v1376_v4  ;;  %v1377_v9 = vmax.f32 %v1345_v6, 0.0  ;;  %v1954_v10 = vpop.f32.mrb[20].mxu1 }
 0x157   : > { %v2103_v11 = vadd.f32 %v1996_v33, %v1954_v10  ;;  %v1033_v12 = vpop.f32.mrb[21].mxu1  ;;  %v2004_v13 = vpop.f32.mrb[28].mxu0 }
 0x158   : > { %v1414_v15 = vadd.f32 %v1413_v2, %v1377_v9  ;;  %v2104_v16 = vadd.f32 %v1242_v36, %v1033_v12  ;;  %v1400_v17 = vadd.f32 %v1399_v8, %v1378_v7  ;;  %v1955_v18 = vpop.f32.mrb[22].mxu1  ;;  %v1274_v19 = vpop.f32.mrb[29].mxu0 }
 0x159   : > { %v2105_v20 = vadd.f32 %v1997_v39, %v1955_v18  ;;  %v1036_v21 = vpop.f32.mrb[23].mxu1  ;;  %v2005_v22 = vpop.f32.mrb[30].mxu0  ;;  %v1350_v23 = vadd.f32 %v2103_v11, %v2519_v27 }
 0x15a   : > { %v1348_v24 = vadd.f32 %v2104_v16, %v2519_v27  ;;  %v2106_v26 = vadd.f32 %v1245_v43, %v1036_v21  ;;  %v1415_v28 = vadd.f32 %v1414_v15, %v1379_v14  ;;  %v1277_v25 = vpop.f32.mrb[31].mxu0  ;;  %v1795_v15 = vld [vmem:[%s2595_s4] ss:$0 sm:$0xff] }
 0x15b   : > { %v1351_v30 = vadd.f32 %v2105_v20, %v2519_v27  ;;  %v1382_v32 = vmax.f32 %v1350_v23, 0.0  ;;  %v1545_v20 = vld [vmem:[%s492_s13] sm:$0xff] }
 0x15c   : > { %v1380_v29 = vmax.f32 %v1348_v24, 0.0  ;;  %v1349_v31 = vadd.f32 %v2106_v26, %v2519_v27 }
 0x15d   : > { %v1383_v38 = vmax.f32 %v1351_v30, 0.0 }
 0x15e   : > { %v1401_v33 = vadd.f32 %v1400_v17, %v1380_v29  ;;  %v1381_v34 = vmax.f32 %v1349_v31, 0.0  ;;  %v1958_v35 = vpop.f32.mrb[24].mxu1 }
 0x15f   : > { %v2107_v36 = vadd.f32 %v2000_v53, %v1958_v35  ;;  %v1049_v37 = vpop.f32.mrb[25].mxu1 }
 0x160   : > { %v1416_v39 = vadd.f32 %v1415_v28, %v1381_v34  ;;  %v2108_v40 = vadd.f32 %v1258_v59, %v1049_v37  ;;  %v1402_v41 = vadd.f32 %v1401_v33, %v1382_v32  ;;  %v1959_v42 = vpop.f32.mrb[26].mxu1  ;;  %v1546_v33 = vld [vmem:[%s492_s13 + $0x8] sm:$0xff] }
 0x161   : > { %v2109_v44 = vadd.f32 %v2001_v62, %v1959_v42  ;;  %v1052_v43 = vpop.f32.mrb[27].mxu1  ;;  %v1354_v45 = vadd.f32 %v2107_v36, %v2519_v27 }
 0x162   : > { %v1352_v46 = vadd.f32 %v2108_v40, %v2519_v27  ;;  %v2110_v47 = vadd.f32 %v1261_v3, %v1052_v43  ;;  %v1417_v48 = vadd.f32 %v1416_v39, %v1383_v38  ;;  %v2247_v38 = vmov 1  }
 0x163   : > { %v1355_v50 = vadd.f32 %v2109_v44, %v2519_v27  ;;  %v1386_v52 = vmax.f32 %v1354_v45, 0.0  ;;  %2179 = vset.pattern.permute.xlu0 %v2247_v38  ;;  %v2248_v39 = vmov 0  }
 0x164   : > { %v1384_v49 = vmax.f32 %v1352_v46, 0.0  ;;  %v1353_v51 = vadd.f32 %v2110_v47, %v2519_v27  ;;  %2180 = vset.pattern.permute.xlu1 %v2248_v39  ;;  %v1555_v47 = vld [vmem:[%s498_s16] sm:$0xff] }
 0x165   : > { %v1387_v58 = vmax.f32 %v1355_v50, 0.0  ;;  %v1556_v50 = vld [vmem:[%s498_s16 + $0x8] sm:$0xff] }
 0x166   : > { %v1403_v53 = vadd.f32 %v1402_v41, %v1384_v49  ;;  %v1385_v54 = vmax.f32 %v1353_v51, 0.0  ;;  %v1962_v55 = vpop.f32.mrb[28].mxu1 }
 0x167   : > { %v2111_v56 = vadd.f32 %v2004_v13, %v1962_v55  ;;  %v1065_v57 = vpop.f32.mrb[29].mxu1 }
 0x168   : > { %v1418_v59 = vadd.f32 %v1417_v48, %v1385_v54  ;;  %v2112_v60 = vadd.f32 %v1274_v19, %v1065_v57  ;;  %v1404_v61 = vadd.f32 %v1403_v53, %v1386_v52  ;;  %v1963_v62 = vpop.f32.mrb[30].mxu1 }
 0x169   : > { %v2113_v63 = vadd.f32 %v2005_v22, %v1963_v62  ;;  %v1068_v0 = vpop.f32.mrb[31].mxu1  ;;  %v1358_v1 = vadd.f32 %v2111_v56, %v2519_v27 }
 0x16a   : > { %v1356_v2 = vadd.f32 %v2112_v60, %v2519_v27  ;;  %v2114_v3 = vadd.f32 %v1277_v25, %v1068_v0  ;;  %v1419_v4 = vadd.f32 %v1418_v59, %v1387_v58 }
 0x16b   : > { %v1359_v6 = vadd.f32 %v2113_v63, %v2519_v27  ;;  %v1390_v8 = vmax.f32 %v1358_v1, 0.0 }
 0x16c   : > { %v1388_v5 = vmax.f32 %v1356_v2, 0.0  ;;  %v1357_v7 = vadd.f32 %v2114_v3, %v2519_v27 }
 0x16d   : > { %v1391_v11 = vmax.f32 %v1359_v6, 0.0 }
 0x16e   : > { %v1405_v9 = vadd.f32 %v1404_v61, %v1388_v5  ;;  %v1389_v10 = vmax.f32 %v1357_v7, 0.0 }
 0x170   : > { %v1420_v12 = vadd.f32 %v1419_v4, %v1389_v10  ;;  %v1406_v13 = vadd.f32 %v1405_v9, %v1390_v8 }
 0x172   : > { %v1421_v14 = vadd.f32 %v1420_v12, %v1391_v11  ;;  %2038 = vmatprep.mubr.f32.mxu0 %v1406_v13  ;;  %v1583_v12 = vlaneseq }
 0x174   : > { %2039 = vmatmul.mubr.f32.vlgmr.msra.gmra.mrb[32].mxu0 %v1421_v14  ;;  %v1584_v13 = vand.u32 127, %v1583_v12 }
 0x176   : > { %vm1586_vm5 = vcmp.eq.s32.totalorder %v1584_v13, 1  ;;  %vm1585_vm6 = vcmp.eq.s32.totalorder %v1584_v13, 0 }
 0x247   : > { %v2040_v27 = vpop.f32.mrb[32].mxu0 }
 0x248   : > { %v1511_v16 = vpop.f32.mrb[33].mxu0  ;;  %v1517_v18 = vadd.f32 %v2040_v27, %v1795_v15 }
 0x249   : > { %v1512_v17 = vadd.f32 %v1795_v15, %v1511_v16 }
 0x24a   : > { %v1524_v21 = vsel %vm1520_vm2, %v1517_v18, -inf  ;;  %v1548_v36 = vmul.f32 %v1546_v33, %v1517_v18 }
 0x24b   : > { %v1521_v19 = vsel %vm1520_vm2, %v1512_v17, -inf  ;;  %v1547_v22 = vmul.f32 %v1545_v20, %v1512_v17 }
 0x24c   : > { %1522 = vmax.xlane.f32.xlu0 %v1521_v19  ;;  %v1552_v37 = vsel %vm1520_vm2, %v1548_v36, 0.0 }
 0x24d   : > { %v1549_v23 = vsel %vm1520_vm2, %v1547_v22, 0.0 }
 0x250   : > { %1525 = vmax.xlane.f32.xlu0 %v1524_v21 }
 0x254   : > { %1550 = vadd.xlane.f32.xlu0 %v1549_v23 }
 0x2d9   : > { %v1523_v24 = vpop.xlane.xlu0 %1522 }
 0x2da   : > { %v1527_v26 = vsub.f32 %v1512_v17, %v1523_v24 }
 0x2dc   : > { %v1529_v28 = vmul.f32 1.442695, %v1527_v26 }
 0x2dd   : > { %v1526_v25 = vpop.xlane.xlu0 %1525 }
 0x2de   : > { %2215 = vpow2.f32 %v1529_v28  ;;  %v1528_v29 = vsub.f32 %v1517_v18, %v1526_v25 }
 0x2e0   : > { %v1531_v30 = vmul.f32 1.442695, %v1528_v29 }
 0x2e1   : > { %v1551_v46 = vpop.xlane.xlu0 %1550 }
 0x2e2   : > { %2217 = vpow2.f32 %v1531_v30 }
 0x2e8   : > { %v2216_v31 = vpop.eup %2215 }
 0x2e9   : > { %v1533_v32 = vsel %vm1520_vm2, %v2216_v31, 0.0 }
 0x2ea   : > { %1534 = vadd.xlane.f32.xlu1 %v1533_v32 }
 0x2ec   : > { %v2218_v34 = vpop.eup %2217 }
 0x2ed   : > { %v1536_v35 = vsel %vm1520_vm2, %v2218_v34, 0.0 }
 0x2ee   : > { %1537 = vadd.xlane.f32.xlu1 %v1536_v35 }
 0x2f2   : > { %1553 = vadd.xlane.f32.xlu1 %v1552_v37 }
 0x377   : > { %v1535_v40 = vpop.xlane.xlu1 %1534 }
 0x378   : > { %2219 = vlog2.f32 %v1535_v40 }
 0x37b   : > { %v1538_v41 = vpop.xlane.xlu1 %1537 }
 0x37c   : > { %2221 = vlog2.f32 %v1538_v41 }
 0x37f   : > { %v1554_v53 = vpop.xlane.xlu1 %1553 }
 0x382   : > { %v2220_v42 = vpop.eup %2219 }
 0x383   : > { %v1540_v44 = vmul.f32 0.6931472, %v2220_v42 }
 0x385   : > { %v1543_v43 = vadd.f32 %v1540_v44, %v1523_v24 }
 0x386   : > { %v2222_v45 = vpop.eup %2221 }
 0x387   : > { %v1557_v48 = vsub.f32 %v1543_v43, %v1551_v46  ;;  %v1542_v49 = vmul.f32 0.6931472, %v2222_v45  ;;  %v1571_v52 = vmul.f32 %v1555_v47, %v1543_v43 }
 0x389   : > { %v1544_v51 = vadd.f32 %v1542_v49, %v1526_v25  ;;  %v1559_v56 = vmul.f32 %v1557_v48, %v1555_v47  ;;  %v1574_v57 = vsel %vm1573_vm3, %v1571_v52, 0.0 }
 0x38b   : > { %v1572_v54 = vmul.f32 %v1556_v50, %v1544_v51  ;;  %v1558_v55 = vsub.f32 %v1544_v51, %v1554_v53  ;;  %v1562_v61 = vsel %vm1561_vm4, %v1559_v56, 0.0 }
 0x38d   : > { %v1575_v58 = vsel %vm1573_vm3, %v1572_v54, 0.0  ;;  %v1560_v59 = vmul.f32 %v1558_v55, %v1556_v50 }
 0x38e   : > { %v1576_v60 = vadd.f32 %v1575_v58, %v1574_v57 }
 0x38f   : > { %v1563_v62 = vsel %vm1561_vm4, %v1560_v59, 0.0 }
 0x390   : > { %v1577_v63 = vrot.slane %v1576_v60, 4  ;;  %v1564_v0 = vadd.f32 %v1563_v62, %v1562_v61 }
 0x392   : > { %v1565_v1 = vrot.slane %v1564_v0, 4  ;;  %v1578_v2 = vadd.f32 %v1577_v63, %v1576_v60 }
 0x394   : > { %v1566_v3 = vadd.f32 %v1565_v1, %v1564_v0  ;;  %v1579_v4 = vrot.slane %v1578_v2, 2 }
 0x396   : > { %v1580_v5 = vadd.f32 %v1579_v4, %v1578_v2  ;;  %v1567_v6 = vrot.slane %v1566_v3, 2 }
 0x398   : > { %v1581_v7 = vrot.slane %v1580_v5, 1  ;;  %v1568_v8 = vadd.f32 %v1567_v6, %v1566_v3 }
 0x39a   : > { %v1582_v9 = vadd.f32 %v1581_v7, %v1580_v5  ;;  %v1569_v10 = vrot.slane %v1568_v8, 1 }
 0x39c   : > { %1589 = vperm.xlu0 %2179, %v1582_v9   ;;  %v1570_v11 = vadd.f32 %v1569_v10, %v1568_v8 }
 0x39e   : > { %1595 = vperm.xlu1 %2180, %v1570_v11  }
 0x3a0   : > { %2181 = vset.pattern.permute.xlu0 %v2248_v39 }
 0x41b   : > { %v1590_v14 = vpop.permute.xlu0 %1589 }
 0x41c   : > { %v1592_v15 = vsel %vm1586_vm5, %v1590_v14, 0.0 }
 0x41d   : > { %v1596_v27 = vpop.permute.xlu1 %1595 }
 0x41e   : > { %v1598_v16 = vsel %vm1585_vm6, %v1596_v27, %v1592_v15 }
 0x41f   : > { %1599 = vst [vmem:[%s503_s20] sm:$0xff] %v1598_v16 }
 0x420 PF: > { %p14_p10 = scmp.ge.s32.totalorder %s2308_s28, 4   ;;  %s2599_s24 = smov %s2241_s25 }
 0x421   : > { %s2600_s25 = smov %s2317_s8  ;;  %s2601_s26 = smov %s2308_s28 }
 0x422   :  { %16 = sbr.rel (!%p14_p10) target bundleno = 2 (0x2), region = 132 }

</bundles_post_ra>
